<compile_context>
chip_gen: v7x
topology: tpu7x:2x2x1
jax: 0.10.0
libtpu: 0.0.40
codegen_flags: <defaults>
</compile_context>

<pallas_src>
import functools

import jax
import jax.numpy as jnp
from jax import lax
from jax.experimental import pallas as pl
from jax.experimental.pallas import tpu as pltpu


# dot_general dimension numbers for A[m, k] contracted with B[n, k] (A @ B.T).
_TRANS_B = (((1,), (1,)), ((), ()))


def _mlp_kernel(x_ref, wg_ref, wu_ref, wd_ref, o_ref, acc_ref):
    """Fused SwiGLU MLP tile.

    Grid = (M_pad // tm, I // ti). Axis 0 tiles rows of x ("parallel"); axis 1
    tiles the intermediate dimension I, the reduction axis of down_proj, so the
    output tile stays resident across it and is accumulated in f32 VMEM scratch.
    """
    j = pl.program_id(1)

    @pl.when(j == 0)
    def _():
        acc_ref[...] = jnp.zeros_like(acc_ref)

    x = x_ref[...]                                                   # (tm, H)
    # gate/up weights are PyTorch-layout [I, H] blocks of shape (ti, H):
    g = lax.dot_general(x, wg_ref[...], _TRANS_B,
                        preferred_element_type=jnp.float32)          # (tm, ti)
    u = lax.dot_general(x, wu_ref[...], _TRANS_B,
                        preferred_element_type=jnp.float32)          # (tm, ti)
    # SiLU (Mistral hidden_act = "silu"): g * sigmoid(g), kept in f32.
    h = (g * jax.nn.sigmoid(g)) * u
    # down weight is PyTorch-layout [H, I] block of shape (H, ti):
    acc_ref[...] += lax.dot_general(h.astype(wd_ref.dtype), wd_ref[...], _TRANS_B,
                                    preferred_element_type=jnp.float32)  # (tm, H)

    @pl.when(j == pl.num_programs(1) - 1)
    def _():
        o_ref[...] = acc_ref[...].astype(o_ref.dtype)


def _round_up(n, m):
    return -(-n // m) * m


def _pick_ti(I, target):
    """Largest multiple-of-128 divisor of I that is <= target, else I itself."""
    if I <= target:
        return I
    t = (target // 128) * 128
    while t >= 128:
        if I % t == 0:
            return t
        t -= 128
    return I


@functools.partial(
    jax.jit, static_argnames=("tm", "ti", "compute_dtype", "vmem_limit_bytes"))
def mistral_mlp(x, w_gate, w_up, w_down, *, tm=None, ti=None,
                compute_dtype=None, vmem_limit_bytes=None):
    """x: [B, S, H]; PyTorch nn.Linear-layout weights (no transposes needed):
         w_gate, w_up: [I, H]
         w_down      : [H, I]
    Returns [B, S, H] in x.dtype.
    For best throughput store/pass the weights in bf16; matmuls run in the
    weight dtype with f32 accumulation.
    """
    B, S, H = x.shape
    I, H2 = w_gate.shape
    assert H2 == H and w_up.shape == (I, H) and w_down.shape == (H, I)

    out_dtype = x.dtype
    if compute_dtype is None:
        compute_dtype = w_gate.dtype  # bf16 weights -> bf16 MXU operands

    M = B * S
    # Row tile: large enough to fill the MXU and amortize weight DMA.
    if tm is None:
        tm = min(256, _round_up(M, 8))
    # Intermediate tile: v7x-safe default (double-buffered bf16 weight tiles at
    # H=4096, ti=512 -> ~24 MiB). Raise ti (e.g. 1024+) on v5e/v6e if desired.
    if ti is None:
        ti = _pick_ti(I, 512)
    assert I % ti == 0, "ti must divide the intermediate size"

    M_pad = _round_up(M, tm)
    x2 = x.reshape(M, H).astype(compute_dtype)
    if M_pad != M:
        x2 = jnp.pad(x2, ((0, M_pad - M), (0, 0)))

    # NOTE: casts are no-ops when the caller already stores weights in
    # compute_dtype (recommended). No transposes are performed.
    wg = w_gate.astype(compute_dtype)
    wu = w_up.astype(compute_dtype)
    wd = w_down.astype(compute_dtype)

    cbytes = jnp.dtype(compute_dtype).itemsize
    obytes = jnp.dtype(out_dtype).itemsize
    if vmem_limit_bytes is None:
        per_step = (tm * H * cbytes            # x tile
                    + 2 * ti * H * cbytes      # gate + up weight tiles
                    + H * ti * cbytes          # down weight tile
                    + tm * H * obytes)         # output tile
        est = 2 * per_step + tm * H * 4        # double buffers + f32 accumulator
        vmem_limit_bytes = min(max(int(est * 1.25), 32 << 20), 110 << 20)

    out = pl.pallas_call(
        _mlp_kernel,
        out_shape=jax.ShapeDtypeStruct((M_pad, H), out_dtype),
        grid_spec=pltpu.PrefetchScalarGridSpec(
            num_scalar_prefetch=0,
            grid=(M_pad // tm, I // ti),
            in_specs=[
                pl.BlockSpec((tm, H), lambda i, j: (i, 0)),   # x rows
                pl.BlockSpec((ti, H), lambda i, j: (j, 0)),   # gate weight [I, H]
                pl.BlockSpec((ti, H), lambda i, j: (j, 0)),   # up weight   [I, H]
                pl.BlockSpec((H, ti), lambda i, j: (0, j)),   # down weight [H, I]
            ],
            out_specs=pl.BlockSpec((tm, H), lambda i, j: (i, 0)),
            scratch_shapes=[pltpu.VMEM((tm, H), jnp.float32)],
        ),
        compiler_params=pltpu.CompilerParams(
            dimension_semantics=("parallel", "arbitrary"),
            vmem_limit_bytes=vmem_limit_bytes),
    )(x2, wg, wu, wd)

    if M_pad != M:
        out = out[:M]
    return out.reshape(B, S, H)


def _reference_mlp(x, w_gate, w_up, w_down):
    g = x @ w_gate.T
    u = x @ w_up.T
    h = (g * jax.nn.sigmoid(g)) * u
    return h @ w_down.T


if __name__ == "__main__":
    # Small config consistent with MistralMLP: hidden_size=128, intermediate=256.
    B, S, H, I = 2, 8, 128, 256

    key = jax.random.PRNGKey(0)
    kx, kg, ku, kd = jax.random.split(key, 4)

    x = jax.random.normal(kx, (B, S, H), dtype=jnp.float32)
    # Deterministic synthetic weights in PyTorch nn.Linear layout [out, in].
    w_gate = jax.random.normal(kg, (I, H), dtype=jnp.float32) * 0.02
    w_up = jax.random.normal(ku, (I, H), dtype=jnp.float32) * 0.02
    w_down = jax.random.normal(kd, (H, I), dtype=jnp.float32) * 0.02

    ref = _reference_mlp(x, w_gate, w_up, w_down)

    # f32 path (tight tolerance).
    out = jax.block_until_ready(mistral_mlp(x, w_gate, w_up, w_down))
    assert out.shape == (B, S, H)
    assert jnp.allclose(out, ref, atol=1e-5, rtol=1e-5), "f32 mismatch vs reference"

    # Ragged-M / padding path: force a row tile larger than M.
    out_pad = jax.block_until_ready(mistral_mlp(x, w_gate, w_up, w_down, tm=128))
    assert jnp.allclose(out_pad, ref, atol=1e-5, rtol=1e-5), "padded-M mismatch"

    # bf16-weight path (the performance configuration), looser tolerance.
    out_bf16 = jax.block_until_ready(
        mistral_mlp(x.astype(jnp.bfloat16),
                    w_gate.astype(jnp.bfloat16),
                    w_up.astype(jnp.bfloat16),
                    w_down.astype(jnp.bfloat16)))
    assert jnp.allclose(out_bf16.astype(jnp.float32), ref, atol=2e-2, rtol=2e-2), \
        "bf16 mismatch vs reference"

    print("KERNEL_OK")
</pallas_src>

<mosaic_0001>
module attributes {stable_mosaic.version = 11 : i64} {
  func.func @_mlp_kernel(%arg0: i32, %arg1: i32, %arg2: memref<16x128xf32, #tpu.memory_space<vmem>>, %arg3: memref<256x128xf32, #tpu.memory_space<vmem>>, %arg4: memref<256x128xf32, #tpu.memory_space<vmem>>, %arg5: memref<128x256xf32, #tpu.memory_space<vmem>>, %arg6: memref<16x128xf32, #tpu.memory_space<vmem>>, %arg7: memref<16x128xf32, #tpu.memory_space<vmem>>) attributes {dimension_semantics = [#tpu.dimension_semantics<parallel>, #tpu.dimension_semantics<arbitrary>], iteration_bounds = array<i64: 1, 1>, scalar_prefetch = 0 : i64, scratch_operands = 1 : i64, tpu.core_type = #tpu.core_type<tc>, window_params = [{transform_indices = @transform_0, window_bounds = array<i64: 16, 128>}, {transform_indices = @transform_1, window_bounds = array<i64: 256, 128>}, {transform_indices = @transform_2, window_bounds = array<i64: 256, 128>}, {transform_indices = @transform_3, window_bounds = array<i64: 128, 256>}, {transform_indices = @transform_4, window_bounds = array<i64: 16, 128>}]} {
    %c0_i32 = arith.constant 0 : i32
    %0 = arith.cmpi eq, %arg1, %c0_i32 : i32
    %1 = arith.extui %0 : i1 to i32
    %c0_i32_0 = arith.constant 0 : i32
    %2 = arith.cmpi ne, %1, %c0_i32_0 : i32
    scf.if %2 {
      %cst_17 = arith.constant 0.000000e+00 : f32
      %23 = vector.broadcast %cst_17 : f32 to vector<16x128xf32>
      %c0_18 = arith.constant 0 : index
      %c0_19 = arith.constant 0 : index
      %24 = vector.load %arg7[%c0_18, %c0_19] : memref<16x128xf32, #tpu.memory_space<vmem>>, vector<16x128xf32>
      tpu.vector_store %arg7[%c0_18, %c0_19], %23 {strides = array<i32>} : memref<16x128xf32, #tpu.memory_space<vmem>>, vector<16x128xf32>,
    } else {
    }
    %c0 = arith.constant 0 : index
    %c0_1 = arith.constant 0 : index
    %3 = vector.load %arg2[%c0, %c0_1] : memref<16x128xf32, #tpu.memory_space<vmem>>, vector<16x128xf32>
    %c0_2 = arith.constant 0 : index
    %c0_3 = arith.constant 0 : index
    %4 = vector.load %arg3[%c0_2, %c0_3] : memref<256x128xf32, #tpu.memory_space<vmem>>, vector<256x128xf32>
    %cst = arith.constant dense<0.000000e+00> : vector<16x256xf32>
    %5 = tpu.matmul %3, %4, %cst {dimension_numbers = #tpu.dot_dimension_numbers<[1], [1], [0], [0], [0, 0, 1, 0], [], []>} : vector<16x128xf32>, vector<256x128xf32>, vector<16x256xf32> -> vector<16x256xf32>
    %c0_4 = arith.constant 0 : index
    %c0_5 = arith.constant 0 : index
    %6 = vector.load %arg4[%c0_4, %c0_5] : memref<256x128xf32, #tpu.memory_space<vmem>>, vector<256x128xf32>
    %cst_6 = arith.constant dense<0.000000e+00> : vector<16x256xf32>
    %7 = tpu.matmul %3, %6, %cst_6 {dimension_numbers = #tpu.dot_dimension_numbers<[1], [1], [0], [0], [0, 0, 1, 0], [], []>} : vector<16x128xf32>, vector<256x128xf32>, vector<16x256xf32> -> vector<16x256xf32>
    %8 = arith.negf %5 : vector<16x256xf32>
    %9 = math.exp %8 : vector<16x256xf32>
    %cst_7 = arith.constant 1.000000e+00 : f32
    %10 = vector.broadcast %cst_7 : f32 to vector<16x256xf32>
    %11 = arith.addf %10, %9 : vector<16x256xf32>
    %12 = arith.divf %10, %11 : vector<16x256xf32>
    %13 = arith.mulf %5, %12 : vector<16x256xf32>
    %14 = arith.mulf %13, %7 : vector<16x256xf32>
    %c0_8 = arith.constant 0 : index
    %c0_9 = arith.constant 0 : index
    %15 = vector.load %arg7[%c0_8, %c0_9] : memref<16x128xf32, #tpu.memory_space<vmem>>, vector<16x128xf32>
    %c0_10 = arith.constant 0 : index
    %c0_11 = arith.constant 0 : index
    %16 = vector.load %arg5[%c0_10, %c0_11] : memref<128x256xf32, #tpu.memory_space<vmem>>, vector<128x256xf32>
    %cst_12 = arith.constant dense<0.000000e+00> : vector<16x128xf32>
    %17 = tpu.matmul %14, %16, %cst_12 {dimension_numbers = #tpu.dot_dimension_numbers<[1], [1], [0], [0], [0, 0, 1, 0], [], []>} : vector<16x256xf32>, vector<128x256xf32>, vector<16x128xf32> -> vector<16x128xf32>
    %18 = arith.addf %15, %17 : vector<16x128xf32>
    %c0_13 = arith.constant 0 : index
    %c0_14 = arith.constant 0 : index
    %19 = vector.load %arg7[%c0_13, %c0_14] : memref<16x128xf32, #tpu.memory_space<vmem>>, vector<16x128xf32>
    tpu.vector_store %arg7[%c0_13, %c0_14], %18 {strides = array<i32>} : memref<16x128xf32, #tpu.memory_space<vmem>>, vector<16x128xf32>,
    %c0_i32_15 = arith.constant 0 : i32
    %20 = arith.cmpi eq, %arg1, %c0_i32_15 : i32
    %21 = arith.extui %20 : i1 to i32
    %c0_i32_16 = arith.constant 0 : i32
    %22 = arith.cmpi ne, %21, %c0_i32_16 : i32
    scf.if %22 {
      %c0_17 = arith.constant 0 : index
      %c0_18 = arith.constant 0 : index
      %23 = vector.load %arg7[%c0_17, %c0_18] : memref<16x128xf32, #tpu.memory_space<vmem>>, vector<16x128xf32>
      %c0_19 = arith.constant 0 : index
      %c0_20 = arith.constant 0 : index
      %24 = vector.load %arg6[%c0_19, %c0_20] : memref<16x128xf32, #tpu.memory_space<vmem>>, vector<16x128xf32>
      tpu.vector_store %arg6[%c0_19, %c0_20], %23 {strides = array<i32>} : memref<16x128xf32, #tpu.memory_space<vmem>>, vector<16x128xf32>,
    } else {
    }
    return
  }
  func.func @transform_0(%arg0: i32, %arg1: i32) -> (i32, i32) {
    %c0_i32 = arith.constant 0 : i32
    %c0_i32_0 = arith.constant 0 : i32
    return %arg0, %c0_i32 : i32, i32
  }
  func.func @transform_1(%arg0: i32, %arg1: i32) -> (i32, i32) {
    %c0_i32 = arith.constant 0 : i32
    %c0_i32_0 = arith.constant 0 : i32
    return %arg1, %c0_i32 : i32, i32
  }
  func.func @transform_2(%arg0: i32, %arg1: i32) -> (i32, i32) {
    %c0_i32 = arith.constant 0 : i32
    %c0_i32_0 = arith.constant 0 : i32
    return %arg1, %c0_i32 : i32, i32
  }
  func.func @transform_3(%arg0: i32, %arg1: i32) -> (i32, i32) {
    %c0_i32 = arith.constant 0 : i32
    %c0_i32_0 = arith.constant 0 : i32
    return %c0_i32, %arg1 : i32, i32
  }
  func.func @transform_4(%arg0: i32, %arg1: i32) -> (i32, i32) {
    %c0_i32 = arith.constant 0 : i32
    %c0_i32_0 = arith.constant 0 : i32
    return %arg0, %c0_i32 : i32, i32
  }
}

</mosaic_0001>

<bundles_post_ra>
// kernel: mistral_mlp.1
= control target key start
LH: loop header
LB: loop body
LE: loop exit
PB: predicated region body
PF: predicated region fallthrough
CT: control target
= control target key end

     0   :  { %9 = vsyncpa [#allocation4], 0  ;;  %s927_s0 = inlined_call_operand.hbm [shape: f32[16,128], index: 0, kind: input, shape index: {}]   ;;  %s928_s1 = inlined_call_operand.hbm [shape: f32[256,128], index: 1, kind: input, shape index: {}]   ;;  %s929_s2 = inlined_call_operand.hbm [shape: f32[256,128], index: 2, kind: input, shape index: {}]   ;;  %s930_s3 = inlined_call_operand.hbm [shape: f32[128,256], index: 3, kind: input, shape index: {}]   ;;  %s931_s4 = inlined_call_operand.hbm [shape: f32[16,128], index: 4, kind: output, shape index: {}]  }
   0x1   :  { %10 = vsyncpa [#allocation7], 0 }
   0x2   :  { %11 = vsyncpa [#allocation10], 0 }
   0x3   :  { %12 = vsyncpa [#allocation5], 0  ;;  %s801_s15 = smov [#allocation6]   ;;  %s802_s17 = smov [#allocation3]  }
   0x4   :  { %s30_s16 = sshll.u32 %s801_s15, 4  ;;  %s18_s18 = sshll.u32 %s802_s17, 4  ;;  %s31_s16 = int_to_ptr.vmem [resolvable:$true] %s30_s16  ;;  %s835_s18 = int_to_ptr.vmem [resolvable:$true] %s18_s18 }
   0x5   :  { %s683_s21 = scalar_lea.hbm %s928_s1, 4096 }
   0x6   :  { %p684_p0 = scmp.ne.s32.totalorder %s928_s1, %s683_s21  ;;  %p687_p1 = scmp.lt.u32.totalorder %s683_s21, %s928_s1 }
   0x8   :  { %p689_p2 = pnand %p687_p1, %p684_p0 }
   0xa   :  { %692 = shalt.err (!%p689_p2)
}
   0xb   :  { %s693_s26 = scalar_lea.vmem %s31_s16, 4096  ;;  %p698_p4 = scmp.lt.s32.totalorder %s31_s16, %s31_s16 }
   0xc   :  { %p694_p3 = scmp.ne.s32.totalorder %s31_s16, %s693_s26  ;;  %p699_p5 = scmp.lt.s32.totalorder %s693_s26, %s693_s26 }
   0xe   :  { %p700_p6 = por %p699_p5, %p698_p4 }
  0x10   :  { %p701_p7 = pnand %p700_p6, %p694_p3 }
  0x12   :  { %704 = shalt.err (!%p701_p7)
}
  0x13   :  { %s803_s27 = smov 128   ;;  %s804_s28 = smov 8  }
  0x14   :  { %36 = dma.hbm_to_vmem [thread:$0]  %s928_s1, 4096, %s31_s16, [#allocation7], %s803_s27, %s803_s27, %s804_s28  }
  0x15   :  { %s705_s7 = scalar_lea.hbm %s927_s0, 256 }
  0x16   :  { %p706_p8 = scmp.ne.s32.totalorder %s927_s0, %s705_s7  ;;  %p709_p9 = scmp.lt.u32.totalorder %s705_s7, %s927_s0 }
  0x18   :  { %p711_p10 = pnand %p709_p9, %p706_p8 }
  0x1a   :  { %714 = shalt.err (!%p711_p10)
}
  0x1b   :  { %s715_s12 = scalar_lea.vmem %s835_s18, 256  ;;  %p720_p12 = scmp.lt.s32.totalorder %s835_s18, %s835_s18 }
  0x1c   :  { %p716_p11 = scmp.ne.s32.totalorder %s835_s18, %s715_s12  ;;  %p721_p13 = scmp.lt.s32.totalorder %s715_s12, %s715_s12 }
  0x1e   :  { %p722_p0 = por %p721_p13, %p720_p12 }
  0x20   :  { %p723_p1 = pnand %p722_p0, %p716_p11 }
  0x22   :  { %726 = shalt.err (!%p723_p1)
}
  0x23   :  { %24 = dma.hbm_to_vmem [thread:$0]  %s927_s0, 256, %s835_s18, [#allocation4], %s803_s27, %s803_s27, %s804_s28  }
  0x24   :  { %s805_s14 = smov [#allocation8]   ;;  %s806_s16 = smov [#allocation9]  }
  0x25   :  { %s42_s15 = sshll.u32 %s805_s14, 4  ;;  %s54_s17 = sshll.u32 %s806_s16, 4  ;;  %s43_s15 = int_to_ptr.vmem [resolvable:$true] %s42_s15  ;;  %s872_s17 = int_to_ptr.vmem [resolvable:$true] %s54_s17 }
  0x26   :  { %s727_s21 = scalar_lea.hbm %s929_s2, 4096 }
  0x27   :  { %p728_p2 = scmp.ne.s32.totalorder %s929_s2, %s727_s21  ;;  %p731_p3 = scmp.lt.u32.totalorder %s727_s21, %s929_s2 }
  0x29   :  { %p733_p4 = pnand %p731_p3, %p728_p2 }
  0x2b   :  { %736 = shalt.err (!%p733_p4)
}
  0x2c   :  { %s737_s0 = scalar_lea.vmem %s43_s15, 4096  ;;  %p742_p6 = scmp.lt.s32.totalorder %s43_s15, %s43_s15 }
  0x2d   :  { %p738_p5 = scmp.ne.s32.totalorder %s43_s15, %s737_s0  ;;  %p743_p7 = scmp.lt.s32.totalorder %s737_s0, %s737_s0 }
  0x2f   :  { %p744_p8 = por %p743_p7, %p742_p6 }
  0x31   :  { %p745_p9 = pnand %p744_p8, %p738_p5 }
  0x33   :  { %748 = shalt.err (!%p745_p9)
}
  0x34   :  { %48 = dma.hbm_to_vmem [thread:$0]  %s929_s2, 4096, %s43_s15, [#allocation7], %s803_s27, %s803_s27, %s804_s28  }
  0x35   :  { %s749_s5 = scalar_lea.hbm %s930_s3, 4096 }
  0x36   :  { %p750_p10 = scmp.ne.s32.totalorder %s930_s3, %s749_s5  ;;  %p753_p11 = scmp.lt.u32.totalorder %s749_s5, %s930_s3 }
  0x38   :  { %p755_p12 = pnand %p753_p11, %p750_p10 }
  0x3a   :  { %758 = shalt.err (!%p755_p12)
}
  0x3b   :  { %s759_s10 = scalar_lea.vmem %s872_s17, 4096  ;;  %p764_p0 = scmp.lt.s32.totalorder %s872_s17, %s872_s17 }
  0x3c   :  { %p760_p13 = scmp.ne.s32.totalorder %s872_s17, %s759_s10  ;;  %p765_p1 = scmp.lt.s32.totalorder %s759_s10, %s759_s10 }
  0x3e   :  { %p766_p2 = por %p765_p1, %p764_p0 }
  0x40   :  { %p767_p3 = pnand %p766_p2, %p760_p13 }
  0x42   :  { %770 = shalt.err (!%p767_p3)
}
  0x43   :  { %s807_s2 = smov 256   ;;  %s808_s11 = smov 16  }
  0x44   :  { %60 = dma.hbm_to_vmem [thread:$0]  %s930_s3, 4096, %s872_s17, [#allocation10], %s807_s2, %s807_s2, %s808_s11  }
  0x45   :  { %793 = dma.done.wait [#allocation4], 256  }
  0x46   :  { %794 = vsyncadd [#allocation4], 4294967040 }
  0x47   :  { %795 = dma.done.wait [#allocation7], 8192  }
  0x48   :  { %796 = vsyncadd [#allocation7], 4294959104 }
  0x49   :  { %797 = dma.done.wait [#allocation10], 4096  }
  0x4a   :  { %798 = vsyncadd [#allocation10], 4294963200  ;;  %v97_v0 = vld [vmem:[#allocation6 + $0x80] sm:$0xff]  ;;  %v98_v1 = vld [vmem:[#allocation6 + $0x88] sm:$0xff]  ;;  %s809_s3 = smov [#allocation11]  }
  0x4b   :  { %v81_v2 = vld [vmem:[#allocation6] sm:$0xff]  ;;  %v546_v3 = vpack.c.bf16 %v98_v1, %v97_v0  ;;  %v82_v4 = vld [vmem:[#allocation6 + $0x8] sm:$0xff]  ;;  %v99_v5 = vld [vmem:[#allocation6 + $0x90] sm:$0xff]  ;;  %s456_s13 = sshll.u32 %s809_s3, 4  ;;  %s457_s13 = int_to_ptr.vmem [resolvable:$true] %s456_s13 }
  0x4c   :  { %v100_v6 = vld [vmem:[#allocation6 + $0x98] sm:$0xff]  ;;  %v548_v7 = vpack.c.bf16 %v82_v4, %v81_v2  ;;  %v83_v9 = vld [vmem:[#allocation6 + $0x10] sm:$0xff]  ;;  %v101_v11 = vld [vmem:[#allocation6 + $0xa0] sm:$0xff]  ;;  %s771_s14 = scalar_lea.vmem %s457_s13, 256  ;;  %p776_p5 = scmp.lt.s32.totalorder %s457_s13, %s457_s13 }
  0x4d   :  { %v550_v8 = vpack.c.bf16 %v100_v6, %v99_v5  ;;  %547 = vmatprep.subr.bf16.mxu0 %v546_v3  ;;  %v84_v10 = vld [vmem:[#allocation6 + $0x18] sm:$0xff]  ;;  %v206_v12 = vld [vmem:[#allocation8 + $0x80] sm:$0xff]  ;;  %v207_v13 = vld [vmem:[#allocation8 + $0x88] sm:$0xff]  ;;  %p772_p4 = scmp.ne.s32.totalorder %s457_s13, %s771_s14  ;;  %p777_p6 = scmp.lt.s32.totalorder %s771_s14, %s771_s14 }
  0x4e   :  { %549 = vmatpush3.bf16.xpose.msra.mxu0 %v548_v7  ;;  %v102_v14 = vld [vmem:[#allocation6 + $0xa8] sm:$0xff]  ;;  %v578_v15 = vpack.c.bf16 %v207_v13, %v206_v12  ;;  %v190_v16 = vld [vmem:[#allocation8] sm:$0xff]  ;;  %v552_v19 = vpack.c.bf16 %v84_v10, %v83_v9  ;;  %v208_v20 = vld [vmem:[#allocation8 + $0x90] sm:$0xff] }
  0x4f   :  { %551 = vmatprep.subr.bf16.mxu0 %v550_v8  ;;  %v191_v17 = vld [vmem:[#allocation8 + $0x8] sm:$0xff]  ;;  %v209_v21 = vld [vmem:[#allocation8 + $0x98] sm:$0xff]  ;;  %v554_v22 = vpack.c.bf16 %v102_v14, %v101_v11  ;;  %v192_v24 = vld [vmem:[#allocation8 + $0x10] sm:$0xff]  ;;  %p778_p7 = por %p777_p6, %p776_p5 }
  0x50   :  { %v580_v18 = vpack.c.bf16 %v191_v17, %v190_v16  ;;  %579 = vmatprep.subr.bf16.mxu1 %v578_v15  ;;  %v582_v23 = vpack.c.bf16 %v209_v21, %v208_v20  ;;  %v193_v25 = vld [vmem:[#allocation8 + $0x18] sm:$0xff]  ;;  %v210_v26 = vld [vmem:[#allocation8 + $0xa0] sm:$0xff]  ;;  %v211_v27 = vld [vmem:[#allocation8 + $0xa8] sm:$0xff] }
  0x51   :  { %v85_v28 = vld [vmem:[#allocation6 + $0x20] sm:$0xff]  ;;  %v86_v29 = vld [vmem:[#allocation6 + $0x28] sm:$0xff]  ;;  %v584_v30 = vpack.c.bf16 %v193_v25, %v192_v24  ;;  %v103_v31 = vld [vmem:[#allocation6 + $0xb0] sm:$0xff]  ;;  %v586_v33 = vpack.c.bf16 %v211_v27, %v210_v26  ;;  %p779_p8 = pnand %p778_p7, %p772_p4 }
  0x52   :  { %581 = vmatpush3.bf16.xpose.msra.mxu1 %v580_v18  ;;  %v104_v32 = vld [vmem:[#allocation6 + $0xb8] sm:$0xff]  ;;  %v556_v34 = vpack.c.bf16 %v86_v29, %v85_v28  ;;  %v906_v36 = vld [vmem:[#allocation3] sm:$0xff]  ;;  %v194_v37 = vld [vmem:[#allocation8 + $0x20] sm:$0xff] }
  0x53   :  { %583 = vmatprep.subr.bf16.mxu1 %v582_v23  ;;  %v558_v35 = vpack.c.bf16 %v104_v32, %v103_v31  ;;  %v195_v38 = vld [vmem:[#allocation8 + $0x28] sm:$0xff]  ;;  %506 = vmatprep.mubr.f32.mxu0 %v906_v36  ;;  %v212_v39 = vld [vmem:[#allocation8 + $0xb0] sm:$0xff]  ;;  %v213_v40 = vld [vmem:[#allocation8 + $0xb8] sm:$0xff] }
  0x54   :  { %542 = vmatprep.mubr.f32.mxu1 %v906_v36  ;;  %v87_v41 = vld [vmem:[#allocation6 + $0x30] sm:$0xff]  ;;  %v88_v42 = vld [vmem:[#allocation6 + $0x38] sm:$0xff]  ;;  %v588_v43 = vpack.c.bf16 %v195_v38, %v194_v37  ;;  %v105_v44 = vld [vmem:[#allocation6 + $0xc0] sm:$0xff]  ;;  %v590_v46 = vpack.c.bf16 %v213_v40, %v212_v39 }
  0x55   :  { %v106_v45 = vld [vmem:[#allocation6 + $0xc8] sm:$0xff]  ;;  %v560_v47 = vpack.c.bf16 %v88_v42, %v87_v41  ;;  %v196_v49 = vld [vmem:[#allocation8 + $0x30] sm:$0xff]  ;;  %v197_v50 = vld [vmem:[#allocation8 + $0x38] sm:$0xff] }
  0x56   :  { %553 = vmatpush3.bf16.xpose.msra.mxu0 %v552_v19  ;;  %v562_v48 = vpack.c.bf16 %v106_v45, %v105_v44  ;;  %v214_v51 = vld [vmem:[#allocation8 + $0xc0] sm:$0xff]  ;;  %v215_v52 = vld [vmem:[#allocation8 + $0xc8] sm:$0xff]  ;;  %v592_v55 = vpack.c.bf16 %v197_v50, %v196_v49  ;;  %v107_v56 = vld [vmem:[#allocation6 + $0xd0] sm:$0xff] }
  0x57   :  { %555 = vmatprep.subr.bf16.mxu0 %v554_v22  ;;  %v89_v53 = vld [vmem:[#allocation6 + $0x40] sm:$0xff]  ;;  %v90_v54 = vld [vmem:[#allocation6 + $0x48] sm:$0xff]  ;;  %v108_v57 = vld [vmem:[#allocation6 + $0xd8] sm:$0xff]  ;;  %v594_v58 = vpack.c.bf16 %v215_v52, %v214_v51 }
  0x58   :  { %v564_v59 = vpack.c.bf16 %v90_v54, %v89_v53  ;;  %v566_v60 = vpack.c.bf16 %v108_v57, %v107_v56  ;;  %v198_v61 = vld [vmem:[#allocation8 + $0x40] sm:$0xff]  ;;  %v199_v62 = vld [vmem:[#allocation8 + $0x48] sm:$0xff]  ;;  %v216_v63 = vld [vmem:[#allocation8 + $0xd0] sm:$0xff] }
  0x59   :  { %v217_v0 = vld [vmem:[#allocation8 + $0xd8] sm:$0xff]  ;;  %v91_v1 = vld [vmem:[#allocation6 + $0x50] sm:$0xff]  ;;  %v596_v3 = vpack.c.bf16 %v199_v62, %v198_v61  ;;  %v109_v4 = vld [vmem:[#allocation6 + $0xe0] sm:$0xff] }
  0x5a   :  { %585 = vmatpush3.bf16.xpose.msra.mxu1 %v584_v30  ;;  %v92_v2 = vld [vmem:[#allocation6 + $0x58] sm:$0xff]  ;;  %v110_v5 = vld [vmem:[#allocation6 + $0xe8] sm:$0xff]  ;;  %v598_v6 = vpack.c.bf16 %v217_v0, %v216_v63  ;;  %v200_v9 = vld [vmem:[#allocation8 + $0x50] sm:$0xff] }
  0x5b   :  { %587 = vmatprep.subr.bf16.mxu1 %v586_v33  ;;  %v568_v7 = vpack.c.bf16 %v92_v2, %v91_v1  ;;  %v570_v8 = vpack.c.bf16 %v110_v5, %v109_v4  ;;  %v201_v10 = vld [vmem:[#allocation8 + $0x58] sm:$0xff]  ;;  %v218_v11 = vld [vmem:[#allocation8 + $0xe0] sm:$0xff]  ;;  %v219_v12 = vld [vmem:[#allocation8 + $0xe8] sm:$0xff] }
  0x5c   :  { %v93_v13 = vld [vmem:[#allocation6 + $0x60] sm:$0xff]  ;;  %v94_v14 = vld [vmem:[#allocation6 + $0x68] sm:$0xff]  ;;  %v600_v15 = vpack.c.bf16 %v201_v10, %v200_v9  ;;  %v111_v16 = vld [vmem:[#allocation6 + $0xf0] sm:$0xff]  ;;  %v602_v18 = vpack.c.bf16 %v219_v12, %v218_v11 }
  0x5d   :  { %v112_v17 = vld [vmem:[#allocation6 + $0xf8] sm:$0xff]  ;;  %v572_v19 = vpack.c.bf16 %v94_v14, %v93_v13  ;;  %v202_v21 = vld [vmem:[#allocation8 + $0x60] sm:$0xff]  ;;  %v203_v22 = vld [vmem:[#allocation8 + $0x68] sm:$0xff] }
  0x5e   :  { %557 = vmatpush3.bf16.xpose.msra.mxu0 %v556_v34  ;;  %v574_v20 = vpack.c.bf16 %v112_v17, %v111_v16  ;;  %v220_v23 = vld [vmem:[#allocation8 + $0xf0] sm:$0xff]  ;;  %v221_v24 = vld [vmem:[#allocation8 + $0xf8] sm:$0xff]  ;;  %v604_v27 = vpack.c.bf16 %v203_v22, %v202_v21  ;;  %v334_v29 = vld [vmem:[#allocation9 + $0x8] sm:$0xff] }
  0x5f   :  { %559 = vmatprep.subr.bf16.mxu0 %v558_v35  ;;  %v95_v25 = vld [vmem:[#allocation6 + $0x70] sm:$0xff]  ;;  %v96_v26 = vld [vmem:[#allocation6 + $0x78] sm:$0xff]  ;;  %v606_v28 = vpack.c.bf16 %v221_v24, %v220_v23  ;;  %v333_v37 = vld [vmem:[#allocation9] sm:$0xff] }
  0x60   :  { %v336_v30 = vld [vmem:[#allocation9 + $0x18] sm:$0xff]  ;;  %v576_v31 = vpack.c.bf16 %v96_v26, %v95_v25  ;;  %v204_v33 = vld [vmem:[#allocation8 + $0x70] sm:$0xff]  ;;  %v338_v39 = vld [vmem:[#allocation9 + $0x28] sm:$0xff] }
  0x61   :  { %v610_v32 = vpack.c.bf16 %v336_v30, %v334_v29  ;;  %v205_v34 = vld [vmem:[#allocation8 + $0x78] sm:$0xff]  ;;  %v335_v38 = vld [vmem:[#allocation9 + $0x10] sm:$0xff]  ;;  %v337_v44 = vld [vmem:[#allocation9 + $0x20] sm:$0xff] }
  0x62   :  { %589 = vmatpush3.bf16.xpose.msra.mxu1 %v588_v43  ;;  %v608_v35 = vpack.c.bf16 %v205_v34, %v204_v33  ;;  %v340_v40 = vld [vmem:[#allocation9 + $0x38] sm:$0xff]  ;;  %v612_v41 = vpack.c.bf16 %v335_v38, %v333_v37  ;;  %v339_v45 = vld [vmem:[#allocation9 + $0x30] sm:$0xff]  ;;  %v341_v50 = vld [vmem:[#allocation9 + $0x40] sm:$0xff] }
  0x63   :  { %591 = vmatprep.subr.bf16.mxu1 %v590_v46  ;;  %v80_v42 = vld [vmem:[#allocation3 + $0x8] sm:$0xff]  ;;  %v614_v43 = vpack.c.bf16 %v340_v40, %v338_v39  ;;  %v342_v46 = vld [vmem:[#allocation9 + $0x48] sm:$0xff]  ;;  %v343_v51 = vld [vmem:[#allocation9 + $0x50] sm:$0xff] }
  0x64   :  { %v346_v52 = vld [vmem:[#allocation9 + $0x68] sm:$0xff]  ;;  %v348_v53 = vld [vmem:[#allocation9 + $0x78] sm:$0xff]  ;;  %v620_v54 = vpack.c.bf16 %v343_v51, %v341_v50  ;;  %v345_v56 = vld [vmem:[#allocation9 + $0x60] sm:$0xff] }
  0x65   :  { %v349_v61 = vld [vmem:[#allocation9 + $0x80] sm:$0xff]  ;;  %v351_v62 = vld [vmem:[#allocation9 + $0x90] sm:$0xff]  ;;  %v354_v0 = vld [vmem:[#allocation9 + $0xa8] sm:$0xff] }
  0x66   :  { %561 = vmatpush3.bf16.xpose.msra.mxu0 %v560_v47  ;;  %v344_v47 = vld [vmem:[#allocation9 + $0x58] sm:$0xff]  ;;  %v628_v63 = vpack.c.bf16 %v351_v62, %v349_v61  ;;  %v355_v4 = vld [vmem:[#allocation9 + $0xb0] sm:$0xff]  ;;  %v357_v9 = vld [vmem:[#allocation9 + $0xc0] sm:$0xff] }
  0x67   :  { %563 = vmatprep.subr.bf16.mxu0 %v562_v48  ;;  %v616_v48 = vpack.c.bf16 %v339_v45, %v337_v44  ;;  %v618_v49 = vpack.c.bf16 %v344_v47, %v342_v46  ;;  %v356_v1 = vld [vmem:[#allocation9 + $0xb8] sm:$0xff]  ;;  %v359_v10 = vld [vmem:[#allocation9 + $0xd0] sm:$0xff]  ;;  %v362_v12 = vld [vmem:[#allocation9 + $0xe8] sm:$0xff] }
  0x68   :  { %v630_v2 = vpack.c.bf16 %v356_v1, %v354_v0  ;;  %v636_v11 = vpack.c.bf16 %v359_v10, %v357_v9  ;;  %v364_v13 = vld [vmem:[#allocation9 + $0xf8] sm:$0xff]  ;;  %v363_v16 = vld [vmem:[#allocation9 + $0xf0] sm:$0xff] }
  0x69   :  { %v638_v14 = vpack.c.bf16 %v364_v13, %v362_v12 }
  0x6a   :  { %593 = vmatpush3.bf16.xpose.msra.mxu1 %v592_v55  ;;  %v622_v55 = vpack.c.bf16 %v348_v53, %v346_v52 }
  0x6b   :  { %595 = vmatprep.subr.bf16.mxu1 %v594_v58  ;;  %v350_v58 = vld [vmem:[#allocation9 + $0x88] sm:$0xff] }
  0x6e   :  { %565 = vmatpush3.bf16.xpose.msra.mxu0 %v564_v59  ;;  %v352_v59 = vld [vmem:[#allocation9 + $0x98] sm:$0xff] }
  0x6f   :  { %567 = vmatprep.subr.bf16.mxu0 %v566_v60  ;;  %v626_v60 = vpack.c.bf16 %v352_v59, %v350_v58 }
  0x72   :  { %597 = vmatpush3.bf16.xpose.msra.mxu1 %v596_v3  ;;  %v353_v3 = vld [vmem:[#allocation9 + $0xa0] sm:$0xff] }
  0x73   :  { %599 = vmatprep.subr.bf16.mxu1 %v598_v6  ;;  %v632_v5 = vpack.c.bf16 %v355_v4, %v353_v3  ;;  %v358_v6 = vld [vmem:[#allocation9 + $0xc8] sm:$0xff] }
  0x76   :  { %569 = vmatpush3.bf16.xpose.msra.mxu0 %v568_v7  ;;  %v360_v7 = vld [vmem:[#allocation9 + $0xd8] sm:$0xff] }
  0x77   :  { %571 = vmatprep.subr.bf16.mxu0 %v570_v8  ;;  %v634_v8 = vpack.c.bf16 %v360_v7, %v358_v6 }
  0x7a   :  { %601 = vmatpush3.bf16.xpose.msra.mxu1 %v600_v15  ;;  %v361_v15 = vld [vmem:[#allocation9 + $0xe0] sm:$0xff] }
  0x7b   :  { %603 = vmatprep.subr.bf16.mxu1 %v602_v18  ;;  %v640_v17 = vpack.c.bf16 %v363_v16, %v361_v15 }
  0x7e   :  { %573 = vmatpush3.bf16.xpose.msra.mxu0 %v572_v19 }
  0x7f   :  { %575 = vmatprep.subr.bf16.mxu0 %v574_v20 }
  0x82   :  { %605 = vmatpush3.bf16.xpose.msra.mxu1 %v604_v27 }
  0x83   :  { %607 = vmatprep.subr.bf16.mxu1 %v606_v28 }
  0x86   :  { %577 = vmatpush3.bf16.xpose.msra.mxu0 %v576_v31 }
  0x87   :  { %611 = vmatprep.subr.bf16.mxu0 %v610_v32 }
  0x8a   :  { %609 = vmatpush3.bf16.xpose.msra.mxu1 %v608_v35 }
  0x8b   :  { %642 = vmatprep.subr.bf16.mxu1 %v610_v32 }
  0x8d   :  { %507 = vmatmul.mubr.f32.vlgmr.msra.gmra.mrb[0].mxu0 %v906_v36 }
  0x8e   :  { %508 = vmatprep.mubr.f32.mxu0 %v80_v42  ;;  %613 = vmatpush1.bf16.xpose.msra.mxu0 %v612_v41 }
  0x8f   :  { %615 = vmatprep.subr.bf16.mxu0 %v614_v43 }
  0x91   :  { %509 = vmatmul.mubr.f32.gmra.mrb[2].mxu0 %v80_v42  ;;  %543 = vmatmul.mubr.f32.vlgmr.msra.gmra.mrb[0].mxu1 %v906_v36  ;;  %v347_v36 = vld [vmem:[#allocation9 + $0x70] sm:$0xff] }
  0x92   :  { %544 = vmatprep.mubr.f32.mxu1 %v80_v42  ;;  %650 = vmatpush1.bf16.xpose.msra.mxu1 %v612_v41  ;;  %v624_v57 = vpack.c.bf16 %v347_v36, %v345_v56 }
  0x93   :  { %643 = vmatprep.subr.bf16.mxu1 %v614_v43 }
  0x95   :  { %545 = vmatmul.mubr.f32.gmra.mrb[2].mxu1 %v80_v42 }
  0x96   :  { %617 = vmatpush1.bf16.xpose.msra.mxu0 %v616_v48 }
  0x97   :  { %619 = vmatprep.subr.bf16.mxu0 %v618_v49 }
  0x9a   :  { %651 = vmatpush1.bf16.xpose.msra.mxu1 %v616_v48 }
  0x9b   :  { %644 = vmatprep.subr.bf16.mxu1 %v618_v49 }
  0x9e   :  { %621 = vmatpush1.bf16.xpose.msra.mxu0 %v620_v54 }
  0x9f   :  { %623 = vmatprep.subr.bf16.mxu0 %v622_v55 }
  0xa2   :  { %652 = vmatpush1.bf16.xpose.msra.mxu1 %v620_v54 }
  0xa3   :  { %645 = vmatprep.subr.bf16.mxu1 %v622_v55 }
  0xa6   :  { %625 = vmatpush1.bf16.xpose.msra.mxu0 %v624_v57 }
  0xa7   :  { %627 = vmatprep.subr.bf16.mxu0 %v626_v60 }
  0xaa   :  { %653 = vmatpush1.bf16.xpose.msra.mxu1 %v624_v57 }
  0xab   :  { %646 = vmatprep.subr.bf16.mxu1 %v626_v60 }
  0xae   :  { %629 = vmatpush1.bf16.xpose.msra.mxu0 %v628_v63 }
  0xaf   :  { %631 = vmatprep.subr.bf16.mxu0 %v630_v2 }
  0xb2   :  { %654 = vmatpush1.bf16.xpose.msra.mxu1 %v628_v63 }
  0xb3   :  { %647 = vmatprep.subr.bf16.mxu1 %v630_v2 }
  0xb6   :  { %633 = vmatpush1.bf16.xpose.msra.mxu0 %v632_v5 }
  0xb7   :  { %635 = vmatprep.subr.bf16.mxu0 %v634_v8 }
  0xba   :  { %655 = vmatpush1.bf16.xpose.msra.mxu1 %v632_v5 }
  0xbb   :  { %648 = vmatprep.subr.bf16.mxu1 %v634_v8 }
  0xbe   :  { %637 = vmatpush1.bf16.xpose.msra.mxu0 %v636_v11 }
  0xbf   :  { %639 = vmatprep.subr.bf16.mxu0 %v638_v14 }
  0xc2   :  { %656 = vmatpush1.bf16.xpose.msra.mxu1 %v636_v11 }
  0xc3   :  { %649 = vmatprep.subr.bf16.mxu1 %v638_v14 }
  0xc6   :  { %641 = vmatpush1.bf16.xpose.msra.mxu0 %v640_v17 }
  0xca   :  { %657 = vmatpush1.bf16.xpose.msra.mxu1 %v640_v17 }
 0x160   :  { %v179_v18 = vpop.f32.mrb[0].mxu0 }
 0x161   :  { %v470_v19 = vmul.f32 -1.442695, %v179_v18  ;;  %v181_v20 = vpop.f32.mrb[1].mxu0 }
 0x162   :  { %v471_v21 = vmul.f32 -1.442695, %v181_v20 }
 0x163   :  { %667 = vpow2.f32 %v470_v19 }
 0x164   :  { %669 = vpow2.f32 %v471_v21  ;;  %v185_v22 = vpop.f32.mrb[2].mxu0  ;;  %v288_v25 = vpop.f32.mrb[0].mxu1 }
 0x165   :  { %v472_v23 = vmul.f32 -1.442695, %v185_v22  ;;  %v187_v24 = vpop.f32.mrb[3].mxu0  ;;  %v290_v27 = vpop.f32.mrb[1].mxu1 }
 0x166   :  { %v473_v26 = vmul.f32 -1.442695, %v187_v24 }
 0x167   :  { %671 = vpow2.f32 %v472_v23 }
 0x168   :  { %673 = vpow2.f32 %v473_v26  ;;  %v294_v28 = vpop.f32.mrb[2].mxu1 }
 0x169   :  { %v296_v29 = vpop.f32.mrb[3].mxu1 }
 0x16d   :  { %v668_v30 = vpop.eup %667 }
 0x16e   :  { %v670_v31 = vpop.eup %669  ;;  %v311_v32 = vadd.f32 1.0, %v668_v30 }
 0x16f   :  { %v312_v33 = vadd.f32 1.0, %v670_v31 }
 0x170   :  { %675 = vrcp.f32 %v311_v32 }
 0x171   :  { %v672_v34 = vpop.eup %671  ;;  %677 = vrcp.f32 %v312_v33 }
 0x172   :  { %v674_v35 = vpop.eup %673  ;;  %v313_v37 = vadd.f32 1.0, %v672_v34 }
 0x173   :  { %v314_v38 = vadd.f32 1.0, %v674_v35 }
 0x174   :  { %679 = vrcp.f32 %v313_v37 }
 0x175   :  { %681 = vrcp.f32 %v314_v38 }
 0x17a   :  { %v676_v39 = vpop.eup %675 }
 0x17b   :  { %v678_v40 = vpop.eup %677  ;;  %v323_v41 = vmul.f32 %v676_v39, %v179_v18 }
 0x17c   :  { %v324_v42 = vmul.f32 %v678_v40, %v181_v20 }
 0x17d   :  { %v327_v43 = vmul.f32 %v323_v41, %v288_v25 }
 0x17e   :  { %v680_v44 = vpop.eup %679  ;;  %v328_v45 = vmul.f32 %v324_v42, %v290_v27 }
 0x17f   :  { %v682_v46 = vpop.eup %681  ;;  %v325_v47 = vmul.f32 %v680_v44, %v185_v22 }
 0x180   :  { %v326_v48 = vmul.f32 %v682_v46, %v187_v24  ;;  %429 = vmatprep.mubr.f32.mxu0 %v328_v45 }
 0x181   :  { %v329_v49 = vmul.f32 %v325_v47, %v294_v28  ;;  %430 = vmatmul.mubr.f32.vlgmr.msra.gmra.mrb[4].mxu0 %v327_v43 }
 0x182   :  { %v330_v50 = vmul.f32 %v326_v48, %v296_v29 }
 0x184   :  { %434 = vmatprep.mubr.f32.mxu1 %v330_v50 }
 0x185   :  { %435 = vmatmul.mubr.f32.vlgmr.msra.gmra.mrb[4].mxu1 %v329_v49 }
 0x254   :  { %v431_v51 = vpop.f32.mrb[4].mxu0 }
 0x255   :  { %449 = vst [vmem:[#allocation11] sm:$0xff] %v431_v51  ;;  %v433_v52 = vpop.f32.mrb[5].mxu0 }
 0x258   :  { %v436_v53 = vpop.f32.mrb[4].mxu1 }
 0x259   :  { %450 = vst [vmem:[#allocation11 + $0x8] sm:$0xff] %v436_v53  ;;  %v438_v54 = vpop.f32.mrb[5].mxu1 }
 0x25a   :  { %782 = shalt.err (!%p779_p8)
}
 0x25b   :  { %s783_s17 = scalar_lea.hbm %s931_s4, 256 }
 0x25c   :  { %p784_p9 = scmp.ne.s32.totalorder %s931_s4, %s783_s17  ;;  %p787_p10 = scmp.lt.u32.totalorder %s783_s17, %s931_s4 }
 0x25e   :  { %p789_p11 = pnand %p787_p10, %p784_p9 }
 0x260   :  { %792 = shalt.err (!%p789_p11)
}
 0x261   :  { %462 = dma.vmem_to_hbm [thread:$0]  %s457_s13, 256, %s931_s4, [#allocation5], %s803_s27, %s803_s27, %s804_s28  }
 0x262   :  { %799 = dma.done.wait [#allocation5], 256  }
 0x263   :  { %800 = vsyncadd [#allocation5], 4294967040 }
 0x264   :  { %466 = vsyncpa [#allocation4], 1 }
 0x265   :  { %467 = vsyncpa [#allocation7], 1 }
 0x266   :  { %468 = vsyncpa [#allocation10], 1 }
 0x267   :  { %469 = vsyncpa [#allocation5], 1 }

</bundles_post_ra>
